<compile_context>
chip_gen: v5e
topology: v5e:2x2
jax: 0.10.0
libtpu: 0.0.40
codegen_flags: <defaults>
</compile_context>

<pallas_src>
import functools

import jax
import jax.numpy as jnp
from jax.experimental import pallas as pl
from jax.experimental.pallas import tpu as pltpu


_TILE_F32_BYTES = 2 * 1024 * 1024   # ~2 MiB f32 working set per logits tile (v7x-safe)
_MAX_BLOCK_COLS = 8192              # split the class axis beyond this many columns


def _round_down_to(x, m):
    return (x // m) * m


def _choose_blocks(n, c, itemsize, block_rows, block_cols):
    row_mult = 16 if itemsize == 2 else 8

    # Column tile: full C when modest, otherwise a multiple of 128 (online-LSE over k).
    if block_cols is None:
        block_c = c if c <= _MAX_BLOCK_COLS else _MAX_BLOCK_COLS
    else:
        block_c = c if block_cols >= c else min(c, max(128, _round_down_to(int(block_cols), 128)))

    # Row tile: byte-based budget, multiple of row_mult, >=2 tiles when possible.
    if block_rows is not None:
        block_n = min(n, int(block_rows))
        if block_n < n:
            block_n = max(row_mult, _round_down_to(block_n, row_mult))
    elif n <= row_mult:
        block_n = n
    else:
        rows = max(row_mult, _TILE_F32_BYTES // (block_c * 4))
        rows = _round_down_to(rows, row_mult)
        if rows >= n:
            # Guarantee >=2 row tiles so the "parallel" axis shards across v7x's 2 TCs.
            rows = max(row_mult, _round_down_to(n // 2, row_mult))
        block_n = min(rows, n)
    return block_n, block_c


def _ls_ce_kernel(logits_ref, targets_ref, out_ref,
                  m_acc, l_acc, sum_acc, pick_acc, *,
                  smoothing, n_valid, n_classes, block_cols, ragged_c):
    # logits_ref : (TN, TC) float (f32 or bf16)   -- one (row, col) tile
    # targets_ref: (TN, 1)  int32
    # out_ref    : (1, 8, 128) f32                -- per-row-tile partial sum (broadcast)
    # m/l/sum/pick_acc : (TN, 1) f32 scratch accumulators (online LSE over the col axis)
    i = pl.program_id(0)           # row tile ("parallel")
    k = pl.program_id(1)           # col tile ("arbitrary", reduction)
    nk = pl.num_programs(1)

    @pl.when(k == 0)
    def _init():
        m_acc[...] = jnp.full_like(m_acc, -jnp.inf)
        l_acc[...] = jnp.zeros_like(l_acc)
        sum_acc[...] = jnp.zeros_like(sum_acc)
        pick_acc[...] = jnp.zeros_like(pick_acc)

    x = logits_ref[...].astype(jnp.float32)        # (TN, TC) single f32 cast
    tn, tc = x.shape
    tgt = targets_ref[...]                         # (TN, 1) int32
    class_ids = k * block_cols + jax.lax.broadcasted_iota(jnp.int32, (1, tc), 1)

    if ragged_c:
        col_valid = class_ids < n_classes          # (1, TC) — mask garbage tail columns
        x_max_in = jnp.where(col_valid, x, -jnp.inf)
        x_sum_in = jnp.where(col_valid, x, 0.0)
    else:
        x_max_in = x
        x_sum_in = x

    local_m = jnp.max(x_max_in, axis=1, keepdims=True)              # (TN, 1)
    m_new = jnp.maximum(m_acc[...], local_m)                        # (TN, 1)
    # Online LSE: rescale the previous exp-sum (per-row scalar) and add this chunk.
    l_acc[...] = (l_acc[...] * jnp.exp(m_acc[...] - m_new)
                  + jnp.sum(jnp.exp(x_max_in - m_new), axis=1, keepdims=True))
    m_acc[...] = m_new
    sum_acc[...] = sum_acc[...] + jnp.sum(x_sum_in, axis=1, keepdims=True)
    pick_acc[...] = pick_acc[...] + jnp.sum(
        jnp.where(class_ids == tgt, x, 0.0), axis=1, keepdims=True)

    @pl.when(k == nk - 1)
    def _finalize():
        # loss_r = (1-s)*(lse - x[r, t_r]) + s*(lse - sum_c x[r, c] / C)
        lse = m_acc[...] + jnp.log(l_acc[...])                      # (TN, 1)
        s = jnp.float32(smoothing)
        inv_c = jnp.float32(1.0 / n_classes)
        per_row = (1.0 - s) * (lse - pick_acc[...]) + s * (lse - inv_c * sum_acc[...])

        # Mask rows past the true batch size (ragged tail row-block reads garbage).
        row_ids = i * tn + jax.lax.broadcasted_iota(jnp.int32, (tn, 1), 0)
        per_row = jnp.where(row_ids < n_valid, per_row, 0.0)

        partial = jnp.sum(per_row)                                  # scalar f32
        # Unmasked lane-dense store; wrapper reads [:, 0, 0].
        out_ref[...] = jnp.full((1, 8, 128), partial, jnp.float32)


def label_smoothing_cross_entropy(logits, targets, smoothing=0.1,
                                  block_rows=None, block_cols=None):
    """logits: [N, C] float (f32 or bf16); targets: [N] int class indices -> scalar f32 loss."""
    n, c = logits.shape
    itemsize = jnp.dtype(logits.dtype).itemsize

    block_n, block_c = _choose_blocks(n, c, itemsize, block_rows, block_cols)
    num_row_tiles = pl.cdiv(n, block_n)
    num_col_tiles = pl.cdiv(c, block_c)
    ragged_c = (c % block_c) != 0

    targets2d = targets.astype(jnp.int32).reshape(n, 1)

    kernel = functools.partial(
        _ls_ce_kernel,
        smoothing=float(smoothing), n_valid=n, n_classes=c,
        block_cols=block_c, ragged_c=ragged_c)

    # VMEM limit sized from the real live set (never below the 32 MiB default).
    in_tile_bytes = block_n * block_c * itemsize
    f32_tile_bytes = block_n * block_c * 4
    live_bytes = (2 * in_tile_bytes                 # double-buffered logits blocks
                  + 2 * block_n * 128 * 4           # double-buffered targets blocks (lane-padded)
                  + 6 * f32_tile_bytes              # f32 cast / mask / exp temporaries
                  + 4 * block_n * 128 * 4           # (TN,1) accumulators (lane-padded)
                  + 2 * 8 * 128 * 4)                # output blocks
    vmem_limit = min(48 * 1024 * 1024, max(32 * 1024 * 1024, 2 * live_bytes))

    cost = pl.CostEstimate(
        flops=6 * n * c,
        transcendentals=n * c + 2 * n * num_col_tiles,
        bytes_accessed=n * c * itemsize + n * 4 + num_row_tiles * 8 * 128 * 4,
    )

    partials = pl.pallas_call(
        kernel,
        out_shape=jax.ShapeDtypeStruct((num_row_tiles, 8, 128), jnp.float32),
        grid=(num_row_tiles, num_col_tiles),
        in_specs=[
            pl.BlockSpec((block_n, block_c), lambda i, k: (i, k)),   # logits tile
            pl.BlockSpec((block_n, 1), lambda i, k: (i, 0)),         # targets tile
        ],
        out_specs=pl.BlockSpec((1, 8, 128), lambda i, k: (i, 0, 0)),
        scratch_shapes=[
            pltpu.VMEM((block_n, 1), jnp.float32),   # m_acc
            pltpu.VMEM((block_n, 1), jnp.float32),   # l_acc
            pltpu.VMEM((block_n, 1), jnp.float32),   # sum_acc
            pltpu.VMEM((block_n, 1), jnp.float32),   # pick_acc
        ],
        compiler_params=pltpu.CompilerParams(
            dimension_semantics=("parallel", "arbitrary"),
            vmem_limit_bytes=int(vmem_limit),
        ),
        cost_estimate=cost,
    )(logits, targets2d)

    # Final mean uses the *global* N (garbage tail rows were masked in-kernel).
    return jnp.sum(partials[:, 0, 0]) / jnp.float32(n)


if __name__ == "__main__":
    key = jax.random.PRNGKey(0)
    k1, k2, k3, k4, k5, k6, k7, k8 = jax.random.split(key, 8)

    def ref_loss(lg, tg, s=0.1):
        nc = lg.shape[1]
        log_p = jax.nn.log_softmax(lg.astype(jnp.float32), axis=1)
        one_hot = jax.nn.one_hot(tg, nc, dtype=jnp.float32)
        smooth = (1.0 - s) * one_hot + s / nc
        return jnp.mean(jnp.sum(-smooth * log_p, axis=1))

    # Case 1: small single-tile problem (batch=8, classes=32), f32.
    logits1 = jax.random.normal(k1, (8, 32), dtype=jnp.float32)
    targets1 = jax.random.randint(k2, (8,), 0, 32, dtype=jnp.int32)
    loss1 = label_smoothing_cross_entropy(logits1, targets1, smoothing=0.1)
    assert jnp.allclose(loss1, ref_loss(logits1, targets1, 0.1), rtol=1e-5, atol=1e-5), (
        loss1, ref_loss(logits1, targets1, 0.1))

    # Case 2: multi-row-tile grid with a ragged (unpadded) tail row block, f32.
    logits2 = jax.random.normal(k3, (20, 128), dtype=jnp.float32)
    targets2 = jax.random.randint(k4, (20,), 0, 128, dtype=jnp.int32)
    loss2 = label_smoothing_cross_entropy(logits2, targets2, smoothing=0.1, block_rows=8)
    assert jnp.allclose(loss2, ref_loss(logits2, targets2, 0.1), rtol=1e-5, atol=1e-5), (
        loss2, ref_loss(logits2, targets2, 0.1))

    # Case 3: bf16 logits stay bf16 across the DMA; kernel accumulates in f32.
    logits3 = logits1.astype(jnp.bfloat16)
    loss3 = label_smoothing_cross_entropy(logits3, targets1, smoothing=0.1)
    assert jnp.allclose(loss3, ref_loss(logits3, targets1, 0.1), rtol=1e-4, atol=1e-4), (
        loss3, ref_loss(logits3, targets1, 0.1))

    # Case 4: column-split online-LSE path (3 col tiles, even split), 2 row tiles.
    logits4 = jax.random.normal(k5, (16, 384), dtype=jnp.float32)
    targets4 = jax.random.randint(k6, (16,), 0, 384, dtype=jnp.int32)
    loss4 = label_smoothing_cross_entropy(logits4, targets4, smoothing=0.1, block_cols=128)
    assert jnp.allclose(loss4, ref_loss(logits4, targets4, 0.1), rtol=1e-5, atol=1e-5), (
        loss4, ref_loss(logits4, targets4, 0.1))

    # Case 5: ragged rows AND ragged columns with the online-LSE accumulator.
    logits5 = jax.random.normal(k7, (20, 200), dtype=jnp.float32)
    targets5 = jax.random.randint(k8, (20,), 0, 200, dtype=jnp.int32)
    loss5 = label_smoothing_cross_entropy(logits5, targets5, smoothing=0.1, block_cols=128)
    jax.block_until_ready(loss5)
    assert jnp.allclose(loss5, ref_loss(logits5, targets5, 0.1), rtol=1e-5, atol=1e-5), (
        loss5, ref_loss(logits5, targets5, 0.1))

    print("KERNEL_OK")
</pallas_src>

<mosaic_0001>
module attributes {stable_mosaic.version = 11 : i64} {
  func.func @_ls_ce_kernel(%arg0: i32, %arg1: i32, %arg2: memref<8x32xf32, #tpu.memory_space<vmem>>, %arg3: memref<8x1xi32, #tpu.memory_space<vmem>>, %arg4: memref<1x8x128xf32, #tpu.memory_space<vmem>>, %arg5: memref<8x1xf32, #tpu.memory_space<vmem>>, %arg6: memref<8x1xf32, #tpu.memory_space<vmem>>, %arg7: memref<8x1xf32, #tpu.memory_space<vmem>>, %arg8: memref<8x1xf32, #tpu.memory_space<vmem>>) attributes {dimension_semantics = [#tpu.dimension_semantics<parallel>, #tpu.dimension_semantics<arbitrary>], iteration_bounds = array<i64: 1, 1>, scalar_prefetch = 0 : i64, scratch_operands = 4 : i64, tpu.core_type = #tpu.core_type<tc>, window_params = [{transform_indices = @transform_0, window_bounds = array<i64: 8, 32>}, {transform_indices = @transform_1, window_bounds = array<i64: 8, 1>}, {transform_indices = @transform_2, window_bounds = array<i64: 1, 8, 128>}]} {
    %c0_i32 = arith.constant 0 : i32
    %0 = arith.cmpi eq, %arg1, %c0_i32 : i32
    %1 = arith.extui %0 : i1 to i32
    %c0_i32_0 = arith.constant 0 : i32
    %2 = arith.cmpi ne, %1, %c0_i32_0 : i32
    scf.if %2 {
      %cst_28 = arith.constant 0xFF800000 : f32
      %44 = vector.broadcast %cst_28 : f32 to vector<8x1xf32>
      %c0_29 = arith.constant 0 : index
      %c0_30 = arith.constant 0 : index
      %45 = vector.load %arg5[%c0_29, %c0_30] : memref<8x1xf32, #tpu.memory_space<vmem>>, vector<8x1xf32>
      tpu.vector_store %arg5[%c0_29, %c0_30], %44 {strides = array<i32>} : memref<8x1xf32, #tpu.memory_space<vmem>>, vector<8x1xf32>,
      %cst_31 = arith.constant 0.000000e+00 : f32
      %46 = vector.broadcast %cst_31 : f32 to vector<8x1xf32>
      %c0_32 = arith.constant 0 : index
      %c0_33 = arith.constant 0 : index
      %47 = vector.load %arg6[%c0_32, %c0_33] : memref<8x1xf32, #tpu.memory_space<vmem>>, vector<8x1xf32>
      tpu.vector_store %arg6[%c0_32, %c0_33], %46 {strides = array<i32>} : memref<8x1xf32, #tpu.memory_space<vmem>>, vector<8x1xf32>,
      %cst_34 = arith.constant 0.000000e+00 : f32
      %48 = vector.broadcast %cst_34 : f32 to vector<8x1xf32>
      %c0_35 = arith.constant 0 : index
      %c0_36 = arith.constant 0 : index
      %49 = vector.load %arg7[%c0_35, %c0_36] : memref<8x1xf32, #tpu.memory_space<vmem>>, vector<8x1xf32>
      tpu.vector_store %arg7[%c0_35, %c0_36], %48 {strides = array<i32>} : memref<8x1xf32, #tpu.memory_space<vmem>>, vector<8x1xf32>,
      %cst_37 = arith.constant 0.000000e+00 : f32
      %50 = vector.broadcast %cst_37 : f32 to vector<8x1xf32>
      %c0_38 = arith.constant 0 : index
      %c0_39 = arith.constant 0 : index
      %51 = vector.load %arg8[%c0_38, %c0_39] : memref<8x1xf32, #tpu.memory_space<vmem>>, vector<8x1xf32>
      tpu.vector_store %arg8[%c0_38, %c0_39], %50 {strides = array<i32>} : memref<8x1xf32, #tpu.memory_space<vmem>>, vector<8x1xf32>,
    } else {
    }
    %c0 = arith.constant 0 : index
    %c0_1 = arith.constant 0 : index
    %3 = vector.load %arg2[%c0, %c0_1] : memref<8x32xf32, #tpu.memory_space<vmem>>, vector<8x32xf32>
    %c0_2 = arith.constant 0 : index
    %c0_3 = arith.constant 0 : index
    %4 = vector.load %arg3[%c0_2, %c0_3] : memref<8x1xi32, #tpu.memory_space<vmem>>, vector<8x1xi32>
    %c32_i32 = arith.constant 32 : i32
    %5 = arith.muli %arg1, %c32_i32 : i32
    %6 = tpu.iota {dimensions = array<i32: 1>} : vector<1x32xi32>
    %7 = vector.broadcast %5 : i32 to vector<1x32xi32>
    %8 = arith.addi %7, %6 : vector<1x32xi32>
    %cst = arith.constant dense<0xFF800000> : vector<8xf32>
    %9 = vector.multi_reduction <maximumf>, %3, %cst [1] : vector<8x32xf32> to vector<8xf32>
    %10 = vector.shape_cast %9 : vector<8xf32> to vector<8x1xf32>
    %c0_4 = arith.constant 0 : index
    %c0_5 = arith.constant 0 : index
    %11 = vector.load %arg5[%c0_4, %c0_5] : memref<8x1xf32, #tpu.memory_space<vmem>>, vector<8x1xf32>
    %12 = arith.maximumf %11, %10 : vector<8x1xf32>
    %c0_6 = arith.constant 0 : index
    %c0_7 = arith.constant 0 : index
    %13 = vector.load %arg6[%c0_6, %c0_7] : memref<8x1xf32, #tpu.memory_space<vmem>>, vector<8x1xf32>
    %c0_8 = arith.constant 0 : index
    %c0_9 = arith.constant 0 : index
    %14 = vector.load %arg5[%c0_8, %c0_9] : memref<8x1xf32, #tpu.memory_space<vmem>>, vector<8x1xf32>
    %15 = arith.subf %14, %12 : vector<8x1xf32>
    %16 = math.exp %15 : vector<8x1xf32>
    %17 = arith.mulf %13, %16 : vector<8x1xf32>
    %18 = vector.broadcast %12 : vector<8x1xf32> to vector<8x32xf32>
    %19 = arith.subf %3, %18 : vector<8x32xf32>
    %20 = math.exp %19 : vector<8x32xf32>
    %cst_10 = arith.constant dense<0.000000e+00> : vector<8xf32>
    %21 = vector.multi_reduction <add>, %20, %cst_10 [1] : vector<8x32xf32> to vector<8xf32>
    %22 = vector.shape_cast %21 : vector<8xf32> to vector<8x1xf32>
    %23 = arith.addf %17, %22 : vector<8x1xf32>
    %c0_11 = arith.constant 0 : index
    %c0_12 = arith.constant 0 : index
    %24 = vector.load %arg6[%c0_11, %c0_12] : memref<8x1xf32, #tpu.memory_space<vmem>>, vector<8x1xf32>
    tpu.vector_store %arg6[%c0_11, %c0_12], %23 {strides = array<i32>} : memref<8x1xf32, #tpu.memory_space<vmem>>, vector<8x1xf32>,
    %c0_13 = arith.constant 0 : index
    %c0_14 = arith.constant 0 : index
    %25 = vector.load %arg5[%c0_13, %c0_14] : memref<8x1xf32, #tpu.memory_space<vmem>>, vector<8x1xf32>
    tpu.vector_store %arg5[%c0_13, %c0_14], %12 {strides = array<i32>} : memref<8x1xf32, #tpu.memory_space<vmem>>, vector<8x1xf32>,
    %c0_15 = arith.constant 0 : index
    %c0_16 = arith.constant 0 : index
    %26 = vector.load %arg7[%c0_15, %c0_16] : memref<8x1xf32, #tpu.memory_space<vmem>>, vector<8x1xf32>
    %cst_17 = arith.constant dense<0.000000e+00> : vector<8xf32>
    %27 = vector.multi_reduction <add>, %3, %cst_17 [1] : vector<8x32xf32> to vector<8xf32>
    %28 = vector.shape_cast %27 : vector<8xf32> to vector<8x1xf32>
    %29 = arith.addf %26, %28 : vector<8x1xf32>
    %c0_18 = arith.constant 0 : index
    %c0_19 = arith.constant 0 : index
    %30 = vector.load %arg7[%c0_18, %c0_19] : memref<8x1xf32, #tpu.memory_space<vmem>>, vector<8x1xf32>
    tpu.vector_store %arg7[%c0_18, %c0_19], %29 {strides = array<i32>} : memref<8x1xf32, #tpu.memory_space<vmem>>, vector<8x1xf32>,
    %c0_20 = arith.constant 0 : index
    %c0_21 = arith.constant 0 : index
    %31 = vector.load %arg8[%c0_20, %c0_21] : memref<8x1xf32, #tpu.memory_space<vmem>>, vector<8x1xf32>
    %32 = vector.broadcast %8 : vector<1x32xi32> to vector<8x32xi32>
    %33 = vector.broadcast %4 : vector<8x1xi32> to vector<8x32xi32>
    %34 = arith.cmpi eq, %32, %33 : vector<8x32xi32>
    %cst_22 = arith.constant 0.000000e+00 : f32
    %35 = vector.broadcast %cst_22 : f32 to vector<8x32xf32>
    %36 = arith.select %34, %3, %35 : vector<8x32xi1>, vector<8x32xf32>
    %cst_23 = arith.constant dense<0.000000e+00> : vector<8xf32>
    %37 = vector.multi_reduction <add>, %36, %cst_23 [1] : vector<8x32xf32> to vector<8xf32>
    %38 = vector.shape_cast %37 : vector<8xf32> to vector<8x1xf32>
    %39 = arith.addf %31, %38 : vector<8x1xf32>
    %c0_24 = arith.constant 0 : index
    %c0_25 = arith.constant 0 : index
    %40 = vector.load %arg8[%c0_24, %c0_25] : memref<8x1xf32, #tpu.memory_space<vmem>>, vector<8x1xf32>
    tpu.vector_store %arg8[%c0_24, %c0_25], %39 {strides = array<i32>} : memref<8x1xf32, #tpu.memory_space<vmem>>, vector<8x1xf32>,
    %c0_i32_26 = arith.constant 0 : i32
    %41 = arith.cmpi eq, %arg1, %c0_i32_26 : i32
    %42 = arith.extui %41 : i1 to i32
    %c0_i32_27 = arith.constant 0 : i32
    %43 = arith.cmpi ne, %42, %c0_i32_27 : i32
    scf.if %43 {
      %c0_28 = arith.constant 0 : index
      %c0_29 = arith.constant 0 : index
      %44 = vector.load %arg5[%c0_28, %c0_29] : memref<8x1xf32, #tpu.memory_space<vmem>>, vector<8x1xf32>
      %c0_30 = arith.constant 0 : index
      %c0_31 = arith.constant 0 : index
      %45 = vector.load %arg6[%c0_30, %c0_31] : memref<8x1xf32, #tpu.memory_space<vmem>>, vector<8x1xf32>
      %46 = math.log %45 : vector<8x1xf32>
      %47 = arith.addf %44, %46 : vector<8x1xf32>
      %cst_32 = arith.constant 1.000000e+00 : f32
      %cst_33 = arith.constant 1.000000e-01 : f32
      %48 = arith.subf %cst_32, %cst_33 : f32
      %c0_34 = arith.constant 0 : index
      %c0_35 = arith.constant 0 : index
      %49 = vector.load %arg8[%c0_34, %c0_35] : memref<8x1xf32, #tpu.memory_space<vmem>>, vector<8x1xf32>
      %50 = arith.subf %47, %49 : vector<8x1xf32>
      %51 = vector.broadcast %48 : f32 to vector<8x1xf32>
      %52 = arith.mulf %51, %50 : vector<8x1xf32>
      %c0_36 = arith.constant 0 : index
      %c0_37 = arith.constant 0 : index
      %53 = vector.load %arg7[%c0_36, %c0_37] : memref<8x1xf32, #tpu.memory_space<vmem>>, vector<8x1xf32>
      %cst_38 = arith.constant 3.125000e-02 : f32
      %54 = vector.broadcast %cst_38 : f32 to vector<8x1xf32>
      %55 = arith.mulf %54, %53 : vector<8x1xf32>
      %56 = arith.subf %47, %55 : vector<8x1xf32>
      %cst_39 = arith.constant 1.000000e-01 : f32
      %57 = vector.broadcast %cst_39 : f32 to vector<8x1xf32>
      %58 = arith.mulf %57, %56 : vector<8x1xf32>
      %59 = arith.addf %52, %58 : vector<8x1xf32>
      %c8_i32 = arith.constant 8 : i32
      %60 = arith.muli %arg0, %c8_i32 : i32
      %61 = tpu.iota {dimensions = array<i32: 0>} : vector<8x1xi32>
      %62 = vector.broadcast %60 : i32 to vector<8x1xi32>
      %63 = arith.addi %62, %61 : vector<8x1xi32>
      %c8_i32_40 = arith.constant 8 : i32
      %64 = vector.broadcast %c8_i32_40 : i32 to vector<8x1xi32>
      %65 = arith.cmpi slt, %63, %64 : vector<8x1xi32>
      %cst_41 = arith.constant 0.000000e+00 : f32
      %66 = vector.broadcast %cst_41 : f32 to vector<8x1xf32>
      %67 = arith.select %65, %59, %66 : vector<8x1xi1>, vector<8x1xf32>
      %68 = vector.shape_cast %67 : vector<8x1xf32> to vector<1x8x1xf32>
      %cst_42 = arith.constant dense<0.000000e+00> : vector<1xf32>
      %69 = vector.multi_reduction <add>, %68, %cst_42 [1, 2] : vector<1x8x1xf32> to vector<1xf32>
      %70 = vector.shape_cast %69 : vector<1xf32> to vector<1x1x1xf32>
      %71 = vector.extract %70[0, 0, 0] : f32 from vector<1x1x1xf32>
      %72 = vector.broadcast %71 : f32 to vector<1x8x128xf32>
      %c0_43 = arith.constant 0 : index
      %c0_44 = arith.constant 0 : index
      %c0_45 = arith.constant 0 : index
      %73 = vector.load %arg4[%c0_43, %c0_44, %c0_45] : memref<1x8x128xf32, #tpu.memory_space<vmem>>, vector<1x8x128xf32>
      tpu.vector_store %arg4[%c0_43, %c0_44, %c0_45], %72 {strides = array<i32>} : memref<1x8x128xf32, #tpu.memory_space<vmem>>, vector<1x8x128xf32>,
    } else {
    }
    return
  }
  func.func @transform_0(%arg0: i32, %arg1: i32) -> (i32, i32) {
    %c0_i32 = arith.constant 0 : i32
    return %arg0, %arg1 : i32, i32
  }
  func.func @transform_1(%arg0: i32, %arg1: i32) -> (i32, i32) {
    %c0_i32 = arith.constant 0 : i32
    %c0_i32_0 = arith.constant 0 : i32
    return %arg0, %c0_i32 : i32, i32
  }
  func.func @transform_2(%arg0: i32, %arg1: i32) -> (i32, i32, i32) {
    %c0_i32 = arith.constant 0 : i32
    %c0_i32_0 = arith.constant 0 : i32
    %c0_i32_1 = arith.constant 0 : i32
    return %arg0, %c0_i32, %c0_i32_0 : i32, i32, i32
  }
}

</mosaic_0001>

<bundles_post_ra>
// kernel: tpu_custom_call.1
= control target key start
LH: loop header
LB: loop body
LE: loop exit
PB: predicated region body
PF: predicated region fallthrough
CT: control target
= control target key end

     0   :  { %vm28_vm0 = vcmask 261120   ;;  %s203_s0 = inlined_call_operand.vmem [shape: f32[8,32], index: 0, kind: input, shape index: {}]   ;;  %s204_s1 = inlined_call_operand.vmem [shape: s32[8,1], index: 1, kind: input, shape index: {}]   ;;  %s205_s2 = inlined_call_operand.hbm [shape: f32[1,8,128], index: 2, kind: output, shape index: {}]  }
   0x1   :  { %v21_v0 = vld [vmem:[%s203_s0] sm:$0xff] }
   0x2   :  { %7 = vsyncpa [#allocation7], 0  ;;  %v29_v1 = vsel %vm28_vm0, %v21_v0, -inf  ;;  %vm16_vm1 = vcmask 7168   ;;  %v162_v2 = vmov -inf   ;;  %v163_v3 = vmov 0  }
   0x3   :  { %30 = vmax.xlane.f32.xlu0 %v29_v1  ;;  %17 = vst.msk [vmem:[#allocation2] sm:$0xff] %vm16_vm1, %v162_v2  ;;  %129 = vset.pattern.permute.xlu1 %v163_v3  ;;  %v164_v4 = vmov 0.0   ;;  %v22_v5 = vld [vmem:[%s204_s1] sm:$0xff]  ;;  %v55_v10 = vsel %vm28_vm0, %v21_v0, 0.0  ;;  %v24_v11 = vlaneseq  ;;  %s165_s0 = smov [#allocation6]   ;;  %s113_s15 = sshll.u32 %s205_s2, 4  ;;  %s114_s15 = int_to_ptr.hbm [resolvable:$true] %s113_s15 }
   0x4   :  { %128 = vset.pattern.permute.xlu0 %v163_v3  ;;  %18 = vst.msk [vmem:[#allocation3] sm:$0xff] %vm16_vm1, %v164_v4  ;;  %62 = vperm.xlu1 %129, %v22_v5   ;;  %s111_s1 = sshll.u32 %s165_s0, 4  ;;  %s112_s1 = int_to_ptr.vmem [resolvable:$true] %s111_s1 }
   0x5   :  { %19 = vst.msk [vmem:[#allocation4] sm:$0xff] %vm16_vm1, %v164_v4  ;;  %56 = vadd.xlane.f32.xlu2 %v55_v10  ;;  %v25_v13 = vand.u32 127, %v24_v11 }
   0x6   :  { %20 = vst.msk [vmem:[#allocation5] sm:$0xff] %vm16_vm1, %v164_v4 }
   0xa   :  { %v32_v6 = vld [vmem:[#allocation2] sm:$0xff] }
   0xb   :  { %v34_v29 = vld [vmem:[#allocation3] sm:$0xff] }
   0xc   :  { %v54_v22 = vld [vmem:[#allocation4] sm:$0xff] }
   0xd   :  { %v60_v24 = vld [vmem:[#allocation5] sm:$0xff] }
  0x76   :  { %v31_v7 = vpop.xlane.xlu0 %30  ;;  %v63_v12 = vpop.permute.xlu1 %62 }
  0x77   :  { %v33_v8 = vmax.f32 %v32_v6, %v31_v7  ;;  %vm64_vm2 = vcmp.eq.s32.totalorder %v25_v13, %v63_v12 }
  0x78   :  { %v65_v14 = vsel %vm64_vm2, %v21_v0, 0.0  ;;  %v57_v21 = vpop.xlane.xlu2 %56 }
  0x79   :  { %v35_v9 = vsub.f32 %v32_v6, %v33_v8  ;;  %53 = vst.msk [vmem:[#allocation2] sm:$0xff] %vm16_vm1, %v33_v8  ;;  %41 = vperm.xlu0 %128, %v33_v8   ;;  %v66_v15 = vsel %vm28_vm0, %v65_v14, 0.0  ;;  %v58_v23 = vadd.f32 %v57_v21, %v54_v22 }
  0x7a   :  { %67 = vadd.xlane.f32.xlu2 %v66_v15 }
  0x7b   :  { %59 = vst.msk [vmem:[#allocation4] sm:$0xff] %vm16_vm1, %v58_v23  ;;  %v36_v27 = vmul.f32 1.442695, %v35_v9 }
  0x80   :  { %v74_v37 = vld [vmem:[#allocation2] sm:$0xff] }
  0x82   :  { %v82_v35 = vld [vmem:[#allocation4] sm:$0xff] }
  0x83   :  { %v83_v40 = vmul.f32 0.03125, %v82_v35 }
  0xeb   :  { %v42_v16 = vpop.permute.xlu0 %41 }
  0xec   :  { %v44_v17 = vsub.f32 %v21_v0, %v42_v16 }
  0xed   :  { %v68_v25 = vpop.xlane.xlu2 %67 }
  0xee   :  { %v45_v18 = vmul.f32 1.442695, %v44_v17  ;;  %v69_v26 = vadd.f32 %v68_v25, %v60_v24 }
  0xf0   :  { %130 = vpow2.f32 %v45_v18  ;;  %70 = vst.msk [vmem:[#allocation5] sm:$0xff] %vm16_vm1, %v69_v26 }
  0xf1   :  { %132 = vpow2.f32 %v36_v27 }
  0xf6   :  { %v131_v19 = vpop.eup %130 }
  0xf7   :  { %v47_v20 = vsel %vm28_vm0, %v131_v19, 0.0  ;;  %v133_v28 = vpop.eup %132  ;;  %v79_v38 = vld [vmem:[#allocation5] sm:$0xff] }
  0xf8   :  { %48 = vadd.xlane.f32.xlu1 %v47_v20  ;;  %v38_v30 = vmul.f32 %v133_v28, %v34_v29 }
 0x16b   :  { %v49_v31 = vpop.xlane.xlu1 %48 }
 0x16c   :  { %v50_v32 = vadd.f32 %v49_v31, %v38_v30 }
 0x16e   :  { %52 = vst.msk [vmem:[#allocation3] sm:$0xff] %vm16_vm1, %v50_v32 }
 0x175   :  { %v75_v33 = vld [vmem:[#allocation3] sm:$0xff] }
 0x176   :  { %134 = vlog2.f32 %v75_v33 }
 0x17c   :  { %v135_v34 = vpop.eup %134 }
 0x17d   :  { %v77_v36 = vmul.f32 0.6931472, %v135_v34 }
 0x17f   :  { %v78_v39 = vadd.f32 %v77_v36, %v74_v37 }
 0x181   :  { %v80_v41 = vsub.f32 %v78_v39, %v79_v38  ;;  %v84_v42 = vsub.f32 %v78_v39, %v83_v40 }
 0x183   :  { %v81_v43 = vmul.f32 0.9, %v80_v41  ;;  %v85_v44 = vmul.f32 0.1, %v84_v42 }
 0x185   :  { %v86_v45 = vadd.f32 %v85_v44, %v81_v43 }
 0x187   :  { %v94_v46 = vsel %vm16_vm1, %v86_v45, 0.0 }
 0x188   :  { %95 = vadd.xlane.f32.xlu2 %v94_v46 }
 0x1fb   :  { %v96_v47 = vpop.xlane.xlu2 %95 }
 0x1fc   :  { %v97_v48 = vrot.slane %v96_v47, 4 }
 0x1fe   :  { %v98_v49 = vadd.f32 %v97_v48, %v96_v47 }
 0x200   :  { %v99_v50 = vrot.slane %v98_v49, 2 }
 0x202   :  { %v100_v51 = vadd.f32 %v99_v50, %v98_v49 }
 0x204   :  { %v101_v52 = vrot.slane %v100_v51, 1 }
 0x206   :  { %v102_v53 = vadd.f32 %v101_v52, %v100_v51 }
 0x208   :  { %122 = vpush %v102_v53 }
 0x239   :  { %s123_s16 = spop %122 }
 0x23a   :  { %v104_v54 = vstv %s123_s16 }
 0x23b   :  { %105 = vst [vmem:[#allocation6] sm:$0xff] %v104_v54 }
 0x23c   :  { %116 = dma.vmem_to_hbm [thread:$0]  %s112_s1, 128, %s114_s15, [#allocation7]  }
 0x23d   :  { %160 = dma.done.wait [#allocation7], 128  }
 0x23e   :  { %161 = vsyncadd [#allocation7], 4294967168 }
 0x23f   :  { %121 = vsyncpa [#allocation7], 1 }

</bundles_post_ra>
